<compile_context>
chip_gen: v6e
topology: v6e:2x2x1
jax: 0.10.0
libtpu: 0.0.40
codegen_flags: <defaults>
</compile_context>

<pallas_src>
import jax
import jax.numpy as jnp
from jax.experimental import pallas as pl
from jax.experimental.pallas import tpu as pltpu

IN_FEATURES = 28 * 28          # 784
HIDDEN = 100
N_OUT = 10
HIDDEN_PAD = 128               # lane-dense hidden width
OUT_PAD = 32                   # slim padded output width (>= N_OUT)
MAX_TB = 2048                  # batch tile cap (multiple of 16)


def _round_up(x, m):
    return ((x + m - 1) // m) * m


def convnet_fwd_kernel(x_ref, w1_ref, b1_ref, w2_ref, b2_ref, o_ref):
    # x_ref:  [TB, 784]        f32  flattened input tile (cast to bf16 here)
    # w1_ref: [784, 128]       bf16 fc_layer1 weight (transposed, zero-padded)
    # b1_ref: [1, 128]         f32  fc_layer1 bias (zero-padded)
    # w2_ref: [128, 32]        bf16 output_layer weight (transposed, zero-padded)
    # b2_ref: [1, 32]          f32  output_layer bias (zero-padded)
    # o_ref:  [TB, 32]         f32  padded logits (cols 10..31 are zero)
    x = x_ref[...].astype(jnp.bfloat16)     # cast per block; no wrapper convert pass
    h = jnp.dot(x, w1_ref[...], preferred_element_type=jnp.float32) + b1_ref[...]
    # Sigmoid: exp on EUP, reciprocal on EUP (approx vrcp) -> no VALU divide.
    h = pl.reciprocal(1.0 + jnp.exp(-h), approx=True)
    h = h.astype(jnp.bfloat16)
    out = jnp.dot(h, w2_ref[...], preferred_element_type=jnp.float32) + b2_ref[...]
    o_ref[...] = out.astype(o_ref.dtype)


def pad_params(w1, b1, w2, b2):
    """Zero-pad weights/biases to lane-dense widths. Call ONCE at init.

    Padded hidden units compute sigmoid(0) = 0.5, but the corresponding w2
    rows are zero so they add nothing to the logits; padded output columns
    are exactly zero.
    """
    w1_p = jnp.zeros((IN_FEATURES, HIDDEN_PAD), jnp.bfloat16)
    w1_p = w1_p.at[:, :HIDDEN].set(w1.astype(jnp.bfloat16))
    b1_p = jnp.zeros((1, HIDDEN_PAD), jnp.float32).at[:, :HIDDEN].set(b1)
    w2_p = jnp.zeros((HIDDEN_PAD, OUT_PAD), jnp.bfloat16)
    w2_p = w2_p.at[:HIDDEN, :N_OUT].set(w2.astype(jnp.bfloat16))
    b2_p = jnp.zeros((1, OUT_PAD), jnp.float32).at[:, :N_OUT].set(b2)
    return w1_p, b1_p, w2_p, b2_p


def _choose_batch_tile(B):
    """Batch tile: multiple of 16, floor 16, cap MAX_TB, >=2 tiles when big."""
    b16 = _round_up(max(B, 16), 16)
    if b16 <= 32:
        return b16                       # tiny batch: one small tile
    # Split into at least two tiles so ("parallel",) can use both v7x cores.
    half = _round_up(pl.cdiv(b16, 2), 16)
    return min(MAX_TB, half)


def convnet_forward(x_nchw, w1_p, b1_p, w2_p, b2_p):
    """x_nchw: [B, 1, 28, 28] float32 -> logits [B, 10] float32.

    w1_p/b1_p/w2_p/b2_p are the pre-padded parameters from pad_params().
    """
    B = x_nchw.shape[0]
    x_flat = x_nchw.reshape(B, -1)       # f32, same order as torch .view(B, -1)

    tb = _choose_batch_tile(B)
    b_pad = _round_up(B, tb)
    if b_pad != B:
        # Only triggered for ragged batches; for typical power-of-two / tile-
        # divisible batch sizes this copy is skipped entirely.
        x_flat = jnp.pad(x_flat, ((0, b_pad - B), (0, 0)))

    grid = (b_pad // tb,)

    flops = 2 * b_pad * (IN_FEATURES * HIDDEN_PAD + HIDDEN_PAD * OUT_PAD)
    transcendentals = b_pad * HIDDEN_PAD
    bytes_accessed = (
        b_pad * IN_FEATURES * 4                       # x (f32)
        + IN_FEATURES * HIDDEN_PAD * 2                # w1 (bf16)
        + HIDDEN_PAD * OUT_PAD * 2                    # w2 (bf16)
        + HIDDEN_PAD * 4 + OUT_PAD * 4                # biases (f32)
        + b_pad * OUT_PAD * 4                         # padded logits (f32)
    )

    out_padded = pl.pallas_call(
        convnet_fwd_kernel,
        out_shape=jax.ShapeDtypeStruct((b_pad, OUT_PAD), jnp.float32),
        grid=grid,
        in_specs=[
            pl.BlockSpec((tb, IN_FEATURES), lambda i: (i, 0)),
            pl.BlockSpec((IN_FEATURES, HIDDEN_PAD), lambda i: (0, 0)),
            pl.BlockSpec((1, HIDDEN_PAD), lambda i: (0, 0)),
            pl.BlockSpec((HIDDEN_PAD, OUT_PAD), lambda i: (0, 0)),
            pl.BlockSpec((1, OUT_PAD), lambda i: (0, 0)),
        ],
        out_specs=pl.BlockSpec((tb, OUT_PAD), lambda i: (i, 0)),
        compiler_params=pltpu.CompilerParams(
            dimension_semantics=("parallel",),
            # Covers tb=2048 double-buffered on v5e's 16 MiB default scoped
            # VMEM; equal to the v6e/v7x defaults.
            vmem_limit_bytes=32 * 1024 * 1024),
        cost_estimate=pl.CostEstimate(
            flops=flops,
            transcendentals=transcendentals,
            bytes_accessed=bytes_accessed),
    )(x_flat, w1_p, b1_p, w2_p, b2_p)

    # Slice off batch padding and padded logit columns (cheap XLA slice).
    return out_padded[:B, :N_OUT]


def init_params(key):
    """Deterministic parameter init (shapes match nn.Linear(784,100) / (100,10))."""
    k1, k2, k3, k4 = jax.random.split(key, 4)
    # Mimic torch's kaiming-uniform bound 1/sqrt(fan_in) for plausible scales.
    bound1 = 1.0 / jnp.sqrt(784.0)
    bound2 = 1.0 / jnp.sqrt(100.0)
    w1 = jax.random.uniform(k1, (IN_FEATURES, HIDDEN), jnp.float32, -bound1, bound1)
    b1 = jax.random.uniform(k2, (1, HIDDEN), jnp.float32, -bound1, bound1)
    w2 = jax.random.uniform(k3, (HIDDEN, N_OUT), jnp.float32, -bound2, bound2)
    b2 = jax.random.uniform(k4, (1, N_OUT), jnp.float32, -bound2, bound2)
    return w1, b1, w2, b2


if __name__ == "__main__":
    key = jax.random.PRNGKey(0)
    k_x, k_p = jax.random.split(key)

    B = 2
    x = jax.random.normal(k_x, (B, 1, 28, 28), jnp.float32)  # NCHW, MNIST-sized
    w1, b1, w2, b2 = init_params(k_p)
    w1_p, b1_p, w2_p, b2_p = pad_params(w1, b1, w2, b2)      # once, at init

    out = convnet_forward(x, w1_p, b1_p, w2_p, b2_p)
    jax.block_until_ready(out)

    # Pure-JAX f32 reference check (tolerance loosened for bf16 matmul inputs).
    x_flat = x.reshape(B, -1)
    ref = jax.nn.sigmoid(x_flat @ w1 + b1) @ w2 + b2
    assert out.shape == (B, N_OUT)
    assert jnp.allclose(out, ref, atol=2e-2, rtol=2e-2), (
        f"max abs err {jnp.max(jnp.abs(out - ref))}")

    print("KERNEL_OK")
</pallas_src>

<mosaic_0001>
module attributes {stable_mosaic.version = 11 : i64} {
  func.func @convnet_fwd_kernel(%arg0: i32, %arg1: memref<16x784xf32, #tpu.memory_space<vmem>>, %arg2: memref<784x128xbf16, #tpu.memory_space<vmem>>, %arg3: memref<1x128xf32, #tpu.memory_space<vmem>>, %arg4: memref<128x32xbf16, #tpu.memory_space<vmem>>, %arg5: memref<1x32xf32, #tpu.memory_space<vmem>>, %arg6: memref<16x32xf32, #tpu.memory_space<vmem>>) attributes {dimension_semantics = [#tpu.dimension_semantics<parallel>], iteration_bounds = array<i64: 1>, scalar_prefetch = 0 : i64, scratch_operands = 0 : i64, tpu.core_type = #tpu.core_type<tc>, window_params = [{transform_indices = @transform_0, window_bounds = array<i64: 16, 784>}, {pipeline_mode = #tpu.pipeline_mode<synchronous>, transform_indices = @transform_1, window_bounds = array<i64: 784, 128>}, {pipeline_mode = #tpu.pipeline_mode<synchronous>, transform_indices = @transform_2, window_bounds = array<i64: 1, 128>}, {pipeline_mode = #tpu.pipeline_mode<synchronous>, transform_indices = @transform_3, window_bounds = array<i64: 128, 32>}, {pipeline_mode = #tpu.pipeline_mode<synchronous>, transform_indices = @transform_4, window_bounds = array<i64: 1, 32>}, {transform_indices = @transform_5, window_bounds = array<i64: 16, 32>}]} {
    %c0 = arith.constant 0 : index
    %c0_0 = arith.constant 0 : index
    %0 = vector.load %arg1[%c0, %c0_0] : memref<16x784xf32, #tpu.memory_space<vmem>>, vector<16x784xf32>
    %1 = arith.truncf %0 : vector<16x784xf32> to vector<16x784xbf16>
    %c0_1 = arith.constant 0 : index
    %c0_2 = arith.constant 0 : index
    %2 = vector.load %arg2[%c0_1, %c0_2] : memref<784x128xbf16, #tpu.memory_space<vmem>>, vector<784x128xbf16>
    %cst = arith.constant dense<0.000000e+00> : vector<16x128xf32>
    %3 = tpu.matmul %1, %2, %cst {dimension_numbers = #tpu.dot_dimension_numbers<[1], [0], [0], [1], [0, 0, 1, 1], [], []>} : vector<16x784xbf16>, vector<784x128xbf16>, vector<16x128xf32> -> vector<16x128xf32>
    %c0_3 = arith.constant 0 : index
    %c0_4 = arith.constant 0 : index
    %4 = vector.load %arg3[%c0_3, %c0_4] : memref<1x128xf32, #tpu.memory_space<vmem>>, vector<1x128xf32>
    %5 = vector.broadcast %4 : vector<1x128xf32> to vector<16x128xf32>
    %6 = arith.addf %3, %5 : vector<16x128xf32>
    %cst_5 = arith.constant 0.000000e+00 : f32
    %7 = vector.broadcast %cst_5 : f32 to vector<16x128xf32>
    %8 = arith.subf %7, %6 : vector<16x128xf32>
    %9 = math.exp %8 : vector<16x128xf32>
    %cst_6 = arith.constant 1.000000e+00 : f32
    %10 = vector.broadcast %cst_6 : f32 to vector<16x128xf32>
    %11 = arith.addf %10, %9 : vector<16x128xf32>
    %12 = tpu.reciprocal %11 {approx = true} : vector<16x128xf32> -> vector<16x128xf32>
    %13 = arith.truncf %12 : vector<16x128xf32> to vector<16x128xbf16>
    %c0_7 = arith.constant 0 : index
    %c0_8 = arith.constant 0 : index
    %14 = vector.load %arg4[%c0_7, %c0_8] : memref<128x32xbf16, #tpu.memory_space<vmem>>, vector<128x32xbf16>
    %cst_9 = arith.constant dense<0.000000e+00> : vector<16x32xf32>
    %15 = tpu.matmul %13, %14, %cst_9 {dimension_numbers = #tpu.dot_dimension_numbers<[1], [0], [0], [1], [0, 0, 1, 1], [], []>} : vector<16x128xbf16>, vector<128x32xbf16>, vector<16x32xf32> -> vector<16x32xf32>
    %c0_10 = arith.constant 0 : index
    %c0_11 = arith.constant 0 : index
    %16 = vector.load %arg5[%c0_10, %c0_11] : memref<1x32xf32, #tpu.memory_space<vmem>>, vector<1x32xf32>
    %17 = vector.broadcast %16 : vector<1x32xf32> to vector<16x32xf32>
    %18 = arith.addf %15, %17 : vector<16x32xf32>
    %c0_12 = arith.constant 0 : index
    %c0_13 = arith.constant 0 : index
    %19 = vector.load %arg6[%c0_12, %c0_13] : memref<16x32xf32, #tpu.memory_space<vmem>>, vector<16x32xf32>
    tpu.vector_store %arg6[%c0_12, %c0_13], %18 {strides = array<i32>} : memref<16x32xf32, #tpu.memory_space<vmem>>, vector<16x32xf32>,
    return
  }
  func.func @transform_0(%arg0: i32) -> (i32, i32) {
    %c0_i32 = arith.constant 0 : i32
    %c0_i32_0 = arith.constant 0 : i32
    return %arg0, %c0_i32 : i32, i32
  }
  func.func @transform_1(%arg0: i32) -> (i32, i32) {
    %c0_i32 = arith.constant 0 : i32
    %c0_i32_0 = arith.constant 0 : i32
    %c0_i32_1 = arith.constant 0 : i32
    return %c0_i32, %c0_i32_0 : i32, i32
  }
  func.func @transform_2(%arg0: i32) -> (i32, i32) {
    %c0_i32 = arith.constant 0 : i32
    %c0_i32_0 = arith.constant 0 : i32
    %c0_i32_1 = arith.constant 0 : i32
    return %c0_i32, %c0_i32_0 : i32, i32
  }
  func.func @transform_3(%arg0: i32) -> (i32, i32) {
    %c0_i32 = arith.constant 0 : i32
    %c0_i32_0 = arith.constant 0 : i32
    %c0_i32_1 = arith.constant 0 : i32
    return %c0_i32, %c0_i32_0 : i32, i32
  }
  func.func @transform_4(%arg0: i32) -> (i32, i32) {
    %c0_i32 = arith.constant 0 : i32
    %c0_i32_0 = arith.constant 0 : i32
    %c0_i32_1 = arith.constant 0 : i32
    return %c0_i32, %c0_i32_0 : i32, i32
  }
  func.func @transform_5(%arg0: i32) -> (i32, i32) {
    %c0_i32 = arith.constant 0 : i32
    %c0_i32_0 = arith.constant 0 : i32
    return %arg0, %c0_i32 : i32, i32
  }
}

</mosaic_0001>

<bundles_post_ra>
// kernel: tpu_custom_call.1
= control target key start
LH: loop header
LB: loop body
LE: loop exit
PB: predicated region body
PF: predicated region fallthrough
CT: control target
= control target key end

     0   :  { %10 = vsyncpa [#allocation3], 0  ;;  %s1180_s0 = inlined_call_operand.hbm [shape: f32[16,784], index: 0, kind: input, shape index: {}]   ;;  %s1181_s1 = inlined_call_operand.hbm [shape: bf16[784,128], index: 1, kind: input, shape index: {}]   ;;  %s1182_s2 = inlined_call_operand.vmem [shape: f32[1,128], index: 2, kind: input, shape index: {}]   ;;  %s1183_s3 = inlined_call_operand.vmem [shape: bf16[128,32], index: 3, kind: input, shape index: {}]   ;;  %s1184_s4 = inlined_call_operand.vmem [shape: f32[1,32], index: 4, kind: input, shape index: {}]   ;;  %s1185_s5 = inlined_call_operand.hbm [shape: f32[16,32], index: 5, kind: output, shape index: {}]  }
   0x1   :  { %11 = vsyncpa [#allocation6], 0 }
   0x2   :  { %12 = vsyncpa [#allocation4], 0  ;;  %s1087_s18 = smov [#allocation2]  }
   0x3   :  { %s18_s19 = sshll.u32 %s1087_s18, 4  ;;  %s19_s19 = int_to_ptr.vmem [resolvable:$true] %s18_s19 }
   0x4   :  { %s1029_s20 = scalar_lea.vmem %s19_s19, 1792  ;;  %p1034_p1 = scmp.lt.s32.totalorder %s19_s19, %s19_s19 }
   0x5   :  { %p1030_p0 = scmp.ne.s32.totalorder %s19_s19, %s1029_s20  ;;  %p1035_p2 = scmp.lt.s32.totalorder %s1029_s20, %s1029_s20 }
   0x7   :  { %p1036_p3 = por %p1035_p2, %p1034_p1 }
   0x9   :  { %p1037_p4 = pnand %p1036_p3, %p1030_p0 }
   0xb   :  { %1040 = shalt.err (!%p1037_p4)
}
   0xc   :  { %s1088_s21 = smov 896   ;;  %s1089_s22 = smov 56  }
   0xd   :  { %24 = dma.hbm_to_vmem [thread:$0]  %s1180_s0, 1792, %s19_s19, [#allocation3], %s1088_s21, %s1088_s21, %s1089_s22  }
   0xe   :  { %s1090_s25 = smov [#allocation5]  }
   0xf   :  { %s30_s26 = sshll.u32 %s1090_s25, 4  ;;  %s31_s26 = int_to_ptr.vmem [resolvable:$true] %s30_s26 }
  0x10   :  { %s1049_s27 = scalar_lea.vmem %s31_s26, 6272  ;;  %p1054_p6 = scmp.lt.s32.totalorder %s31_s26, %s31_s26 }
  0x11   :  { %p1050_p5 = scmp.ne.s32.totalorder %s31_s26, %s1049_s27  ;;  %p1055_p7 = scmp.lt.s32.totalorder %s1049_s27, %s1049_s27 }
  0x13   :  { %p1056_p8 = por %p1055_p7, %p1054_p6 }
  0x15   :  { %p1057_p9 = pnand %p1056_p8, %p1050_p5 }
  0x17   :  { %1060 = shalt.err (!%p1057_p9)
}
  0x18   :  { %s1091_s28 = smov 64   ;;  %s1092_s29 = smov 4  }
  0x19   :  { %36 = dma.hbm_to_vmem [thread:$0]  %s1181_s1, 6272, %s31_s26, [#allocation6], %s1091_s28, %s1091_s28, %s1092_s29  }
  0x1a   :  { %1081 = dma.done.wait [#allocation3], 1792  }
  0x1b   :  { %1082 = vsyncadd [#allocation3], 4294965504 }
  0x1c   :  { %1083 = dma.done.wait [#allocation6], 6272  }
  0x1d   :  { %1084 = vsyncadd [#allocation6], 4294961024  ;;  %v956_v0 = vld [vmem:[#allocation5 + $0x78] sm:$0xff]   ;;  %v960_v4 = vld [vmem:[#allocation5 + $0x70] sm:$0xff]   ;;  %v1093_v43 = vmov 0.0   ;;  %vm1094_vm0 = vmmov 0  }
  0x1e   :  { %v957_v1 = vld [vmem:[#allocation5 + $0x38] sm:$0xff]   ;;  %842 = vmatprep.subr.bf16.mxu0 %v956_v0  ;;  %v961_v5 = vld [vmem:[#allocation5 + $0x30] sm:$0xff]   ;;  %v964_v8 = vld [vmem:[#allocation5 + $0x68] sm:$0xff]   ;;  %vm470_vm1 = vcmask 130048   ;;  %vm761_vm2 = vcmask 261120   ;;  %s1095_s23 = smov [#allocation7]  }
  0x1f   :  { %v958_v2 = vld [vmem:[#allocation5 + $0xf8] sm:$0xff]   ;;  %843 = vmatpush3.bf16.msra.mxu0 %v957_v1  ;;  %v962_v6 = vld [vmem:[#allocation5 + $0xf0] sm:$0xff]   ;;  %v965_v9 = vld [vmem:[#allocation5 + $0x28] sm:$0xff]   ;;  %s769_s24 = sshll.u32 %s1095_s23, 4  ;;  %s770_s24 = int_to_ptr.vmem [resolvable:$true] %s769_s24 }
  0x20   :  { %v959_v3 = vld [vmem:[#allocation5 + $0xb8] sm:$0xff]   ;;  %864 = vmatprep.subr.bf16.mxu1 %v958_v2  ;;  %844 = vmatprep.subr.bf16.mxu0 %v960_v4  ;;  %v963_v7 = vld [vmem:[#allocation5 + $0xb0] sm:$0xff]   ;;  %v966_v10 = vld [vmem:[#allocation5 + $0xe8] sm:$0xff]   ;;  %s1061_s25 = scalar_lea.vmem %s770_s24, 256  ;;  %p1066_p11 = scmp.lt.s32.totalorder %s770_s24, %s770_s24 }
  0x21   :  { %865 = vmatpush3.bf16.msra.mxu1 %v959_v3  ;;  %v967_v11 = vld [vmem:[#allocation5 + $0xa8] sm:$0xff]   ;;  %v968_v12 = vld [vmem:[#allocation5 + $0x60] sm:$0xff]   ;;  %v972_v16 = vld [vmem:[#allocation5 + $0x58] sm:$0xff]   ;;  %p1062_p10 = scmp.ne.s32.totalorder %s770_s24, %s1061_s25  ;;  %p1067_p12 = scmp.lt.s32.totalorder %s1061_s25, %s1061_s25 }
  0x22   :  { %866 = vmatprep.subr.bf16.mxu1 %v962_v6  ;;  %v969_v13 = vld [vmem:[#allocation5 + $0x20] sm:$0xff]   ;;  %v973_v17 = vld [vmem:[#allocation5 + $0x18] sm:$0xff]   ;;  %v976_v20 = vld [vmem:[#allocation5 + $0x50] sm:$0xff]  }
  0x23   :  { %845 = vmatpush3.bf16.msra.mxu0 %v961_v5  ;;  %v970_v14 = vld [vmem:[#allocation5 + $0xe0] sm:$0xff]   ;;  %v974_v18 = vld [vmem:[#allocation5 + $0xd8] sm:$0xff]   ;;  %v977_v21 = vld [vmem:[#allocation5 + $0x10] sm:$0xff]   ;;  %p1068_p13 = por %p1067_p12, %p1066_p11 }
  0x24   :  { %846 = vmatprep.subr.bf16.mxu0 %v964_v8  ;;  %v971_v15 = vld [vmem:[#allocation5 + $0xa0] sm:$0xff]   ;;  %v975_v19 = vld [vmem:[#allocation5 + $0x98] sm:$0xff]   ;;  %v978_v22 = vld [vmem:[#allocation5 + $0xd0] sm:$0xff]  }
  0x25   :  { %867 = vmatpush3.bf16.msra.mxu1 %v963_v7  ;;  %v979_v23 = vld [vmem:[#allocation5 + $0x90] sm:$0xff]   ;;  %v980_v24 = vld [vmem:[#allocation5 + $0x48] sm:$0xff]   ;;  %v984_v28 = vld [vmem:[#allocation5 + $0x40] sm:$0xff]   ;;  %p1069_p0 = pnand %p1068_p13, %p1062_p10 }
  0x26   :  { %868 = vmatprep.subr.bf16.mxu1 %v966_v10  ;;  %v981_v25 = vld [vmem:[#allocation5 + $0x8] sm:$0xff]   ;;  %v985_v29 = vld [vmem:[#allocation5] sm:$0xff]   ;;  %v51_v31 = vld [vmem:[#allocation2 + $0x8] sm:$0xff] }
  0x27   :  { %847 = vmatpush3.bf16.msra.mxu0 %v965_v9  ;;  %v982_v26 = vld [vmem:[#allocation5 + $0xc8] sm:$0xff]   ;;  %v986_v30 = vld [vmem:[#allocation5 + $0xc0] sm:$0xff]   ;;  %v58_v32 = vld [vmem:[#allocation2 + $0x40] sm:$0xff] }
  0x28   :  { %848 = vmatprep.subr.bf16.mxu0 %v968_v12  ;;  %v983_v27 = vld [vmem:[#allocation5 + $0x88] sm:$0xff]   ;;  %v65_v33 = vpack.c.bf16 %v58_v32, %v51_v31  ;;  %v987_v34 = vld [vmem:[#allocation5 + $0x80] sm:$0xff]   ;;  %v50_v35 = vld [vmem:[#allocation2] sm:$0xff] }
  0x29   :  { %869 = vmatpush3.bf16.msra.mxu1 %v967_v11  ;;  %v57_v36 = vld [vmem:[#allocation2 + $0x38] sm:$0xff]  ;;  %v988_v38 = vld [vmem:[#allocation5 + $0x178] sm:$0xff]   ;;  %v60_v40 = vld [vmem:[#allocation2 + $0x50] sm:$0xff] }
  0x2a   :  { %870 = vmatprep.subr.bf16.mxu1 %v970_v14  ;;  %506 = vmatprep.mubr.bf16.mxu0 %v65_v33  ;;  %v64_v37 = vpack.c.bf16 %v57_v36, %v50_v35  ;;  %v53_v39 = vld [vmem:[#allocation2 + $0x18] sm:$0xff]  ;;  %v989_v42 = vld [vmem:[#allocation5 + $0x138] sm:$0xff]   ;;  %v52_v44 = vld [vmem:[#allocation2 + $0x10] sm:$0xff] }
  0x2b   :  { %849 = vmatpush3.bf16.msra.mxu0 %v969_v13  ;;  %v67_v41 = vpack.c.bf16 %v60_v40, %v53_v39  ;;  %v59_v45 = vld [vmem:[#allocation2 + $0x48] sm:$0xff]  ;;  %v990_v47 = vld [vmem:[#allocation5 + $0x170] sm:$0xff]   ;;  %v992_v49 = vld [vmem:[#allocation5 + $0x168] sm:$0xff]  }
  0x2c   :  { %850 = vmatprep.subr.bf16.mxu0 %v972_v16  ;;  %v66_v46 = vpack.c.bf16 %v59_v45, %v52_v44  ;;  %v991_v48 = vld [vmem:[#allocation5 + $0x130] sm:$0xff]   ;;  %v993_v50 = vld [vmem:[#allocation5 + $0x128] sm:$0xff]   ;;  %v994_v51 = vld [vmem:[#allocation5 + $0x160] sm:$0xff]  }
  0x2d   :  { %871 = vmatpush3.bf16.msra.mxu1 %v971_v15  ;;  %547 = vmatprep.mubr.bf16.mxu1 %v67_v41  ;;  %v995_v52 = vld [vmem:[#allocation5 + $0x120] sm:$0xff]   ;;  %v996_v53 = vld [vmem:[#allocation5 + $0x158] sm:$0xff]   ;;  %v998_v55 = vld [vmem:[#allocation5 + $0x150] sm:$0xff]  }
  0x2e   :  { %872 = vmatprep.subr.bf16.mxu1 %v974_v18  ;;  %v997_v54 = vld [vmem:[#allocation5 + $0x118] sm:$0xff]   ;;  %v1004_v56 = vld [vmem:[#allocation5 + $0x180] sm:$0xff]   ;;  %v999_v58 = vld [vmem:[#allocation5 + $0x110] sm:$0xff]  }
  0x2f   :  { %851 = vmatpush3.bf16.msra.mxu0 %v973_v17  ;;  %v55_v57 = vld [vmem:[#allocation2 + $0x28] sm:$0xff]  ;;  %v1000_v59 = vld [vmem:[#allocation5 + $0x148] sm:$0xff]   ;;  %v62_v60 = vld [vmem:[#allocation2 + $0x60] sm:$0xff] }
  0x30   :  { %852 = vmatprep.subr.bf16.mxu0 %v976_v20  ;;  %v69_v61 = vpack.c.bf16 %v62_v60, %v55_v57  ;;  %v56_v62 = vld [vmem:[#allocation2 + $0x30] sm:$0xff]  ;;  %v63_v63 = vld [vmem:[#allocation2 + $0x68] sm:$0xff]  ;;  %v1001_v1 = vld [vmem:[#allocation5 + $0x108] sm:$0xff]  }
  0x31   :  { %873 = vmatpush3.bf16.msra.mxu1 %v975_v19  ;;  %v70_v0 = vpack.c.bf16 %v63_v63, %v56_v62  ;;  %v1002_v2 = vld [vmem:[#allocation5 + $0x140] sm:$0xff]   ;;  %v54_v4 = vld [vmem:[#allocation2 + $0x20] sm:$0xff]  ;;  %v61_v5 = vld [vmem:[#allocation2 + $0x58] sm:$0xff] }
  0x32   :  { %874 = vmatprep.subr.bf16.mxu1 %v978_v22  ;;  %v1003_v3 = vld [vmem:[#allocation5 + $0x100] sm:$0xff]   ;;  %v68_v6 = vpack.c.bf16 %v61_v5, %v54_v4  ;;  %v1005_v7 = vld [vmem:[%s1183_s3 + $0x38] sm:$0xff]   ;;  %v1007_v9 = vld [vmem:[%s1183_s3 + $0x28] sm:$0xff]  }
  0x33   :  { %853 = vmatpush3.bf16.msra.mxu0 %v977_v21  ;;  %v1006_v8 = vld [vmem:[%s1183_s3 + $0x30] sm:$0xff]   ;;  %v1008_v10 = vld [vmem:[%s1183_s3 + $0x20] sm:$0xff]   ;;  %v1009_v11 = vld [vmem:[%s1183_s3 + $0x18] sm:$0xff]  }
  0x34   :  { %854 = vmatprep.subr.bf16.mxu0 %v980_v24  ;;  %v1010_v12 = vld [vmem:[%s1183_s3 + $0x10] sm:$0xff]   ;;  %v1011_v13 = vld [vmem:[%s1183_s3 + $0x8] sm:$0xff]   ;;  %v1012_v14 = vld [vmem:[%s1183_s3] sm:$0xff]  }
  0x35   :  { %875 = vmatpush3.bf16.msra.mxu1 %v979_v23  ;;  %v833_v57 = vld [vmem:[%s1184_s4] ss:$0 sm:$0xff] }
  0x36   :  { %876 = vmatprep.subr.bf16.mxu1 %v982_v26 }
  0x37   :  { %855 = vmatpush3.bf16.msra.mxu0 %v981_v25 }
  0x38   :  { %856 = vmatprep.subr.bf16.mxu0 %v984_v28 }
  0x39   :  { %877 = vmatpush3.bf16.msra.mxu1 %v983_v27  ;;  %v782_v27 = vld [vmem:[%s1182_s2] ss:$0 sm:$0xff] }
  0x3a   :  { %878 = vmatprep.subr.bf16.mxu1 %v986_v30 }
  0x3b   :  { %857 = vmatpush3.bf16.msra.mxu0 %v985_v29 }
  0x3c   :  { %886 = vmatprep.subr.bf16.mxu0 %v988_v38 }
  0x3d   :  { %879 = vmatpush3.bf16.msra.mxu1 %v987_v34 }
  0x3e   :  { %919 = vmatprep.subr.bf16.mxu1 %v1093_v43  ;;  %507 = vmatmul.mubr.bf16.vlgmr.msra.gmra.mxu0 %v64_v37 }
  0x3f   :  { %887 = vmatpush3.bf16.msra.mxu0 %v989_v42  ;;  %588 = vmatprep.mubr.bf16.mxu0 %v69_v61 }
  0x40   :  { %548 = vmatmul.mubr.bf16.vlgmr.msra.gmra.mxu1 %v66_v46  ;;  %888 = vmatprep.subr.bf16.mxu0 %v990_v47 }
  0x41   :  { %921 = vmatprep.mubr.msk.bf16.mxu1 %vm1094_vm0, %v1093_v43  ;;  %920 = vmatpush3.bf16.msra.mxu1 %v1004_v56 }
  0x42   :  { %925 = vmatprep.subr.bf16.mxu1 %v1093_v43 }
  0x43   :  { %889 = vmatpush3.bf16.msra.mxu0 %v991_v48 }
  0x44   :  { %890 = vmatprep.subr.bf16.mxu0 %v992_v49 }
  0x47   :  { %891 = vmatpush3.bf16.msra.mxu0 %v993_v50 }
  0x48   :  { %892 = vmatprep.subr.bf16.mxu0 %v994_v51  ;;  %922 = vmatmul.mubr.msk.bf16.vlgmr.msra.gmra.mxu1 %vm470_vm1, %v70_v0 }
  0x49   :  { %941 = vmatprep.mubr.msk.bf16.mxu1 %vm1094_vm0, %v1093_v43  ;;  %926 = vmatpush3.bf16.msra.mxu1 %v1005_v7 }
  0x4a   :  { %927 = vmatprep.subr.bf16.mxu1 %v1093_v43 }
  0x4b   :  { %893 = vmatpush3.bf16.msra.mxu0 %v995_v52 }
  0x4c   :  { %894 = vmatprep.subr.bf16.mxu0 %v996_v53 }
  0x4d   :  { %928 = vmatpush3.bf16.msra.mxu1 %v1006_v8 }
  0x4e   :  { %929 = vmatprep.subr.bf16.mxu1 %v1093_v43 }
  0x4f   :  { %895 = vmatpush3.bf16.msra.mxu0 %v997_v54 }
  0x50   :  { %896 = vmatprep.subr.bf16.mxu0 %v998_v55 }
  0x51   :  { %930 = vmatpush3.bf16.msra.mxu1 %v1007_v9 }
  0x52   :  { %931 = vmatprep.subr.bf16.mxu1 %v1093_v43 }
  0x53   :  { %897 = vmatpush3.bf16.msra.mxu0 %v999_v58 }
  0x54   :  { %898 = vmatprep.subr.bf16.mxu0 %v1000_v59 }
  0x55   :  { %932 = vmatpush3.bf16.msra.mxu1 %v1008_v10 }
  0x56   :  { %933 = vmatprep.subr.bf16.mxu1 %v1093_v43 }
  0x57   :  { %899 = vmatpush3.bf16.msra.mxu0 %v1001_v1 }
  0x58   :  { %900 = vmatprep.subr.bf16.mxu0 %v1002_v2 }
  0x59   :  { %934 = vmatpush3.bf16.msra.mxu1 %v1009_v11 }
  0x5a   :  { %935 = vmatprep.subr.bf16.mxu1 %v1093_v43 }
  0x5b   :  { %901 = vmatpush3.bf16.msra.mxu0 %v1003_v3 }
  0x5d   :  { %936 = vmatpush3.bf16.msra.mxu1 %v1010_v12 }
  0x5e   :  { %589 = vmatmul.mubr.bf16.vlgmr.msra.gmra.mxu0 %v68_v6  ;;  %937 = vmatprep.subr.bf16.mxu1 %v1093_v43 }
  0x61   :  { %938 = vmatpush3.bf16.msra.mxu1 %v1011_v13 }
  0x62   :  { %939 = vmatprep.subr.bf16.mxu1 %v1093_v43 }
  0x65   :  { %940 = vmatpush3.bf16.msra.mxu1 %v1012_v14 }
  0xfe   :  { %v858_v18 = vpop.f32.mrf.mxu0 }
 0x100   :  { %v880_v15 = vpop.f32.mrf.mxu1  ;;  %v859_v20 = vpop.f32.mrf.mxu0 }
 0x101   :  { %v860_v26 = vadd.f32 %v859_v20, %v858_v18 }
 0x102   :  { %v881_v16 = vpop.f32.mrf.mxu1  ;;  %v861_v23 = vpop.f32.mrf.mxu0 }
 0x103   :  { %v509_v29 = vadd.f32 %v860_v26, %v782_v27  ;;  %v882_v30 = vadd.f32 %v881_v16, %v880_v15 }
 0x104   :  { %v883_v17 = vpop.f32.mrf.mxu1  ;;  %v862_v28 = vpop.f32.mrf.mxu0 }
 0x105   :  { %v863_v31 = vadd.f32 %v862_v28, %v861_v23  ;;  %v550_v34 = vadd.f32 %v882_v30, %v509_v29 }
 0x106   :  { %v884_v19 = vpop.f32.mrf.mxu1 }
 0x107   :  { %v512_v35 = vadd.f32 %v863_v31, %v782_v27  ;;  %v885_v36 = vadd.f32 %v884_v19, %v883_v17 }
 0x108   :  { %v631_v21 = vpop.f32.mrf.mxu1 }
 0x109   :  { %v553_v41 = vadd.f32 %v885_v36, %v512_v35 }
 0x10a   :  { %v923_v22 = vpop.f32.mrf.mxu1 }
 0x10c   :  { %v634_v24 = vpop.f32.mrf.mxu1 }
 0x10e   :  { %v924_v25 = vpop.f32.mrf.mxu1 }
 0x11e   :  { %v902_v32 = vpop.f32.mrf.mxu0 }
 0x120   :  { %v903_v33 = vpop.f32.mrf.mxu0 }
 0x121   :  { %v904_v37 = vadd.f32 %v903_v33, %v902_v32 }
 0x122   :  { %v905_v38 = vpop.f32.mrf.mxu0 }
 0x123   :  { %v591_v39 = vadd.f32 %v904_v37, %v550_v34 }
 0x124   :  { %v906_v40 = vpop.f32.mrf.mxu0 }
 0x125   :  { %v632_v42 = vadd.f32 %v631_v21, %v591_v39  ;;  %v907_v43 = vadd.f32 %v906_v40, %v905_v38 }
 0x127   :  { %v638_v44 = vsub.f32 0.0, %v632_v42  ;;  %v594_v45 = vadd.f32 %v907_v43, %v553_v41 }
 0x129   :  { %v640_v46 = vmul.f32 1.442695, %v638_v44  ;;  %v635_v47 = vadd.f32 %v634_v24, %v594_v45 }
 0x12b   :  { %1013 = vpow2.f32 %v640_v46  ;;  %v639_v48 = vsub.f32 0.0, %v635_v47 }
 0x12d   :  { %v642_v49 = vmul.f32 1.442695, %v639_v48 }
 0x12f   :  { %1015 = vpow2.f32 %v642_v49 }
 0x138   :  { %v1014_v50 = vpop.eup %1013 }
 0x139   :  { %v644_v51 = vadd.f32 1.0, %v1014_v50 }
 0x13b   :  { %1017 = vrcp.f32 %v644_v51 }
 0x13c   :  { %v1016_v52 = vpop.eup %1015 }
 0x13d   :  { %v645_v53 = vadd.f32 1.0, %v1016_v52 }
 0x13f   :  { %1019 = vrcp.f32 %v645_v53 }
 0x148   :  { %v1018_v54 = vpop.eup %1017 }
 0x14c   :  { %v1020_v55 = vpop.eup %1019 }
 0x14d   :  { %v648_v56 = vpack.c.bf16 %v1020_v55, %v1018_v54 }
 0x14f   :  { %942 = vmatmul.mubr.bf16.vlgmr.msra.gmra.mxu1 %v648_v56 }
 0x20f   :  { %v754_v58 = vpop.f32.mrf.mxu1 }
 0x210   :  { %v755_v59 = vadd.f32 %v833_v57, %v754_v58 }
 0x211   :  { %v943_v60 = vpop.f32.mrf.mxu1 }
 0x212   :  { %762 = vst.msk [vmem:[#allocation7] sm:$0xff] %vm761_vm2, %v755_v59 }
 0x213   :  { %v757_v61 = vpop.f32.mrf.mxu1 }
 0x214   :  { %v758_v62 = vadd.f32 %v833_v57, %v757_v61 }
 0x215   :  { %v944_v63 = vpop.f32.mrf.mxu1 }
 0x216   :  { %763 = vst.msk [vmem:[#allocation7 + $0x8] sm:$0xff] %vm761_vm2, %v758_v62 }
 0x217   :  { %1072 = shalt.err (!%p1069_p0)
}
 0x218   :  { %s1096_s4 = smov 128   ;;  %s1097_s26 = smov 8  }
 0x219   :  { %775 = dma.vmem_to_hbm [thread:$0]  %s770_s24, 256, %s1185_s5, [#allocation4], %s1096_s4, %s1096_s4, %s1097_s26  }
 0x21a   :  { %1085 = dma.done.wait [#allocation4], 256  }
 0x21b   :  { %1086 = vsyncadd [#allocation4], 4294967040 }
 0x21c   :  { %779 = vsyncpa [#allocation3], 1 }
 0x21d   :  { %780 = vsyncpa [#allocation6], 1 }
 0x21e   :  { %781 = vsyncpa [#allocation4], 1 }

</bundles_post_ra>
